<compile_context>
chip_gen: v7x
topology: tpu7x:2x2x1
jax: 0.10.0
libtpu: 0.0.40
codegen_flags: <defaults>
</compile_context>

<pallas_src>
import jax
import jax.numpy as jnp
from jax.experimental import pallas as pl
from jax.experimental.pallas import tpu as pltpu


def _intensity_kernel(noise_ref, x_ref, o_ref):
    # noise_ref: (TB, 1) f32 per-row noise;  x_ref / o_ref: (TB, TN) tiles.
    o_ref[...] = x_ref[...] * noise_ref[...].astype(x_ref.dtype)


def _pick_target_bytes():
    """Per-chip tile-size target (bytes per x tile)."""
    try:
        kind = jax.devices()[0].device_kind.lower()
    except Exception:
        kind = ""
    if "v7" in kind:
        return 8 * 1024 * 1024            # ~3.2 TB/s HBM: big tiles pay off
    if "v5e" in kind or "v5 lite" in kind or "v5litepod" in kind:
        return 2 * 1024 * 1024            # 0.82 TB/s: 2 MiB already ~93% step-eff.
    return 4 * 1024 * 1024                # v6e / default


def intensity_forward(x, r, scale, *, donate_x=False):
    """x: (B, C, H, W);  r: (B,) ~ N(0,1);  scale: float (python or traced)."""
    B, C, H, W = x.shape
    N = C * H * W
    dtype = x.dtype
    itemsize = jnp.dtype(dtype).itemsize

    # Per-sample noise, computed once in the wrapper (no per-step scalar reads).
    noise = (1.0 + scale * jnp.clip(r.reshape(B), -2.0, 2.0)).astype(jnp.float32)

    # --- Row folding: make rows sublane-dense when B is tiny -----------------
    sub = {4: 8, 2: 16, 1: 32}.get(itemsize, 8)   # native sublane rows per vreg
    k = 1
    if B < sub:
        for d in range(1, C + 1):
            if C % d == 0:
                k = d
                if B * d >= sub:
                    break
    R = B * k
    Ncol = N // k

    x2 = x.reshape(R, Ncol)                        # lane-dense 2-D view (no copy)
    noise_rows = jnp.repeat(noise, k).reshape(R, 1)

    # --- Tile selection (no padding; Pallas masks ragged edge tiles) ---------
    target_bytes = _pick_target_bytes()
    TB = R if R <= sub else sub

    max_tn_lanes = max(1, target_bytes // (TB * itemsize * 128))
    if Ncol % 128 == 0:
        n_lanes = Ncol // 128
        nt = pl.cdiv(n_lanes, max_tn_lanes)        # number of column tiles
        TN = pl.cdiv(n_lanes, nt) * 128            # near-divisor of Ncol
    else:
        n_lanes = pl.cdiv(Ncol, 128)
        if n_lanes <= max_tn_lanes:
            TN = Ncol                              # one full-width (ragged) tile
        else:
            nt = pl.cdiv(n_lanes, max_tn_lanes)
            TN = pl.cdiv(n_lanes, nt) * 128        # only the edge tile is masked

    # If a single column tile covers everything, widen the row tile toward the
    # target so each grid step still moves a large DMA.
    if TN >= Ncol and R > TB:
        TB = min(R, max(sub, ((target_bytes // (TN * itemsize)) // sub) * sub))

    grid = (pl.cdiv(R, TB), pl.cdiv(Ncol, TN))     # cols innermost (fast) axis

    cost = pl.CostEstimate(
        flops=R * Ncol,
        transcendentals=0,
        bytes_accessed=2 * R * Ncol * itemsize + R * 4,
    )

    out = pl.pallas_call(
        _intensity_kernel,
        out_shape=jax.ShapeDtypeStruct((R, Ncol), dtype),
        grid=grid,
        in_specs=[
            pl.BlockSpec((TB, 1), lambda i, j: (i, 0)),    # per-row noise (reused across j)
            pl.BlockSpec((TB, TN), lambda i, j: (i, j)),   # x tile (lane-dense)
        ],
        out_specs=pl.BlockSpec((TB, TN), lambda i, j: (i, j)),
        compiler_params=pltpu.CompilerParams(
            dimension_semantics=("parallel", "parallel"),
            vmem_limit_bytes=48 * 1024 * 1024,
        ),
        cost_estimate=cost,
        # Only alias x->out when the caller actually donates x; otherwise XLA
        # would insert a defensive copy (an extra full HBM round trip).
        input_output_aliases=({1: 0} if donate_x else {}),
    )(noise_rows, x2)

    return out.reshape(B, C, H, W)


if __name__ == "__main__":
    key = jax.random.PRNGKey(0)
    kx, kr = jax.random.split(key)

    B, C, H, W = 2, 4, 16, 16
    scale = 0.5

    x = jax.random.normal(kx, (B, C, H, W), dtype=jnp.float32)
    # The module samples r ~ randn((B,1,1,1)) at forward time; we sample the
    # equivalent (B,) vector deterministically here and feed it to the kernel.
    r = jax.random.normal(kr, (B,), dtype=jnp.float32)

    fwd = jax.jit(intensity_forward)       # scale traced -> no recompile per value
    out = jax.block_until_ready(fwd(x, r, scale))

    # Pure-JAX reference check
    noise_ref = 1.0 + scale * jnp.clip(r, -2.0, 2.0)
    expected = x * noise_ref.reshape(B, 1, 1, 1)
    assert out.shape == x.shape and out.dtype == x.dtype
    assert jnp.allclose(out, expected, rtol=1e-6, atol=1e-6)

    print("KERNEL_OK")
</pallas_src>

<mosaic_0001>
module attributes {stable_mosaic.version = 11 : i64} {
  func.func @_intensity_kernel(%arg0: i32, %arg1: i32, %arg2: memref<8x1xf32, #tpu.memory_space<vmem>>, %arg3: memref<8x256xf32, #tpu.memory_space<vmem>>, %arg4: memref<8x256xf32, #tpu.memory_space<vmem>>) attributes {dimension_semantics = [#tpu.dimension_semantics<parallel>, #tpu.dimension_semantics<parallel>], iteration_bounds = array<i64: 1, 1>, scalar_prefetch = 0 : i64, scratch_operands = 0 : i64, tpu.core_type = #tpu.core_type<tc>, window_params = [{transform_indices = @transform_0, window_bounds = array<i64: 8, 1>}, {transform_indices = @transform_1, window_bounds = array<i64: 8, 256>}, {transform_indices = @transform_2, window_bounds = array<i64: 8, 256>}]} {
    %c0 = arith.constant 0 : index
    %c0_0 = arith.constant 0 : index
    %0 = vector.load %arg3[%c0, %c0_0] : memref<8x256xf32, #tpu.memory_space<vmem>>, vector<8x256xf32>
    %c0_1 = arith.constant 0 : index
    %c0_2 = arith.constant 0 : index
    %1 = vector.load %arg2[%c0_1, %c0_2] : memref<8x1xf32, #tpu.memory_space<vmem>>, vector<8x1xf32>
    %2 = vector.broadcast %1 : vector<8x1xf32> to vector<8x256xf32>
    %3 = arith.mulf %0, %2 : vector<8x256xf32>
    %c0_3 = arith.constant 0 : index
    %c0_4 = arith.constant 0 : index
    %4 = vector.load %arg4[%c0_3, %c0_4] : memref<8x256xf32, #tpu.memory_space<vmem>>, vector<8x256xf32>
    tpu.vector_store %arg4[%c0_3, %c0_4], %3 {strides = array<i32>} : memref<8x256xf32, #tpu.memory_space<vmem>>, vector<8x256xf32>,
    return
  }
  func.func @transform_0(%arg0: i32, %arg1: i32) -> (i32, i32) {
    %c0_i32 = arith.constant 0 : i32
    %c0_i32_0 = arith.constant 0 : i32
    return %arg0, %c0_i32 : i32, i32
  }
  func.func @transform_1(%arg0: i32, %arg1: i32) -> (i32, i32) {
    %c0_i32 = arith.constant 0 : i32
    return %arg0, %arg1 : i32, i32
  }
  func.func @transform_2(%arg0: i32, %arg1: i32) -> (i32, i32) {
    %c0_i32 = arith.constant 0 : i32
    return %arg0, %arg1 : i32, i32
  }
}

</mosaic_0001>

<bundles_post_ra>
// kernel: intensity_forward.1
= control target key start
LH: loop header
LB: loop body
LE: loop exit
PB: predicated region body
PF: predicated region fallthrough
CT: control target
= control target key end

     0   :  { %v29_v0 = vmov 0   ;;  %s60_s0 = inlined_call_operand.vmem [shape: f32[8,1], index: 0, kind: input, shape index: {}]   ;;  %s61_s1 = inlined_call_operand.vmem [shape: f32[8,256], index: 1, kind: input, shape index: {}]   ;;  %s62_s2 = inlined_call_operand.vmem [shape: f32[8,256], index: 2, kind: output, shape index: {}]  }
   0x1   :  { %28 = vset.pattern.permute.xlu0 %v29_v0  ;;  %v13_v1 = vld [vmem:[%s60_s0] sm:$0xff]  ;;  %v12_v3 = vld [vmem:[%s61_s1 + $0x8] sm:$0xff] }
   0x2   :  { %16 = vperm.xlu0 %28, %v13_v1   ;;  %v11_v2 = vld [vmem:[%s61_s1] sm:$0xff] }
  0x81   :  { %v17_v4 = vpop.permute.xlu0 %16 }
  0x82   :  { %v19_v5 = vmul.f32 %v17_v4, %v11_v2  ;;  %v20_v6 = vmul.f32 %v17_v4, %v12_v3 }
  0x84   :  { %21 = vst [vmem:[%s62_s2] sm:$0xff] %v19_v5  ;;  %22 = vst [vmem:[%s62_s2 + $0x8] sm:$0xff] %v20_v6 }

</bundles_post_ra>
